<compile_context>
chip_gen: v5e
topology: v5e:2x2
jax: 0.10.0
libtpu: 0.0.40
codegen_flags: <defaults>
</compile_context>

<pallas_src>
import jax
import jax.numpy as jnp
from jax.experimental import pallas as pl
from jax.experimental.pallas import tpu as pltpu


def _round_up(x, m):
    return (x + m - 1) // m * m


def policy_net_kernel(
    x_ref,
    w1_ref, b1_ref,
    wh0_ref, bh0_ref,
    wh1_ref, bh1_ref,
    whead_ref, bhead_ref,
    out_ref,
):
    x = x_ref[...]  # [TB, in_dim] f32

    # linear1 -> ReLU
    h = jnp.dot(x, w1_ref[...], preferred_element_type=jnp.float32) + b1_ref[...]
    h = jnp.maximum(h, 0.0)

    # hidden layer 0: Linear -> ReLU
    h = jnp.dot(h, wh0_ref[...], preferred_element_type=jnp.float32) + bh0_ref[...]
    h = jnp.maximum(h, 0.0)

    # hidden layer 1: Linear -> ReLU
    h = jnp.dot(h, wh1_ref[...], preferred_element_type=jnp.float32) + bh1_ref[...]
    h2 = jnp.maximum(h, 0.0)

    # fused (classification || value || zero-pad) head -> one lane-dense store
    out_ref[...] = (
        jnp.dot(h2, whead_ref[...], preferred_element_type=jnp.float32) + bhead_ref[...]
    )


def policy_network_forward(x, params, *, row_tile=512):
    """x: [B, in_dim] f32. params: weights [in, out] and biases [1, out] (f32).

    Returns (value [B, 1], logits [B, out_dim]) matching the PyTorch module.
    """
    B, in_dim = x.shape
    hidden = params["w1"].shape[1]
    out_dim = params["wc"].shape[1]

    # --- Fuse value head into classification head, pad to a lane-dense width ---
    head_w = out_dim + 1
    out_pad = max(128, _round_up(head_w, 128))
    w_head = jnp.zeros((hidden, out_pad), jnp.float32)
    w_head = w_head.at[:, :out_dim].set(params["wc"])
    w_head = w_head.at[:, out_dim:head_w].set(params["wv"])
    b_head = jnp.zeros((1, out_pad), jnp.float32)
    b_head = b_head.at[:, :out_dim].set(params["bc"])
    b_head = b_head.at[:, out_dim:head_w].set(params["bv"])

    # --- Batch row tiling (sublane-aligned); pad batch if needed ---
    tb = min(row_tile, _round_up(B, 8))
    b_pad = _round_up(B, tb)
    if b_pad != B:
        x = jnp.pad(x, ((0, b_pad - B), (0, 0)))
    grid = (b_pad // tb,)

    weight_args = (
        params["w1"], params["b1"],
        params["wh0"], params["bh0"],
        params["wh1"], params["bh1"],
        w_head, b_head,
    )

    def const_spec(arr):
        # Full-array block, constant block index -> weight stays VMEM-resident
        # across grid steps (DMA'd once).  arr.shape is evaluated eagerly inside
        # this helper, so there is no loop-variable late-binding issue.
        return pl.BlockSpec(arr.shape, lambda i: (0, 0))

    in_specs = [pl.BlockSpec((tb, in_dim), lambda i: (i, 0))]
    in_specs += [const_spec(a) for a in weight_args]
    out_specs = pl.BlockSpec((tb, out_pad), lambda i: (i, 0))

    flops = 2 * b_pad * (in_dim * hidden + 2 * hidden * hidden + hidden * out_pad)
    bytes_accessed = 4 * (x.size + sum(int(a.size) for a in weight_args) + b_pad * out_pad)
    cost = pl.CostEstimate(flops=flops, transcendentals=0, bytes_accessed=bytes_accessed)

    out = pl.pallas_call(
        policy_net_kernel,
        out_shape=jax.ShapeDtypeStruct((b_pad, out_pad), jnp.float32),
        grid=grid,
        in_specs=in_specs,
        out_specs=out_specs,
        compiler_params=pltpu.CompilerParams(
            dimension_semantics=("parallel",),  # batch tiles shard across v7x's 2 TCs
        ),
        cost_estimate=cost,
    )(x, *weight_args)

    logits = out[:B, :out_dim]
    value = out[:B, out_dim:out_dim + 1]
    return value, logits


def init_params(key, in_dim, out_dim, hidden_dim=128):
    """Deterministic synthetic init. Weights stored as [in_features, out_features]."""
    ks = jax.random.split(key, 10)

    def lin(kw, kb, fan_in, fan_out):
        bound = 1.0 / jnp.sqrt(fan_in)
        w = jax.random.uniform(kw, (fan_in, fan_out), jnp.float32, -bound, bound)
        b = jax.random.uniform(kb, (1, fan_out), jnp.float32, -bound, bound)
        return w, b

    w1, b1 = lin(ks[0], ks[1], in_dim, hidden_dim)
    wh0, bh0 = lin(ks[2], ks[3], hidden_dim, hidden_dim)
    wh1, bh1 = lin(ks[4], ks[5], hidden_dim, hidden_dim)
    wc, bc = lin(ks[6], ks[7], hidden_dim, out_dim)
    wv, bv = lin(ks[8], ks[9], hidden_dim, 1)
    return {
        "w1": w1, "b1": b1,
        "wh0": wh0, "bh0": bh0,
        "wh1": wh1, "bh1": bh1,
        "wc": wc, "bc": bc,
        "wv": wv, "bv": bv,
    }


def reference_forward(x, p):
    h1 = x @ p["w1"] + p["b1"]
    h = jnp.maximum(h1, 0.0)
    h = jnp.maximum(h @ p["wh0"] + p["bh0"], 0.0)
    h2 = jnp.maximum(h @ p["wh1"] + p["bh1"], 0.0)
    logits = h2 @ p["wc"] + p["bc"]
    value = h2 @ p["wv"] + p["bv"]
    return value, logits


if __name__ == "__main__":
    key = jax.random.PRNGKey(0)
    k_x, k_p, k_x2 = jax.random.split(key, 3)

    B, IN_DIM, OUT_DIM, HIDDEN = 8, 16, 8, 128
    x = jax.random.normal(k_x, (B, IN_DIM), jnp.float32)
    params = init_params(k_p, IN_DIM, OUT_DIM, HIDDEN)

    value, logits = policy_network_forward(x, params)
    value = jax.block_until_ready(value)
    logits = jax.block_until_ready(logits)

    v_ref, l_ref = reference_forward(x, params)
    assert value.shape == (B, 1) and logits.shape == (B, OUT_DIM)
    assert jnp.allclose(value, v_ref, atol=1e-4, rtol=1e-4)
    assert jnp.allclose(logits, l_ref, atol=1e-4, rtol=1e-4)

    # Exercise the multi-tile grid + batch-padding path (non-multiple batch, small tile).
    B2 = 21
    x2 = jax.random.normal(k_x2, (B2, IN_DIM), jnp.float32)
    v2, l2 = policy_network_forward(x2, params, row_tile=8)
    v2 = jax.block_until_ready(v2)
    l2 = jax.block_until_ready(l2)
    v2_ref, l2_ref = reference_forward(x2, params)
    assert v2.shape == (B2, 1) and l2.shape == (B2, OUT_DIM)
    assert jnp.allclose(v2, v2_ref, atol=1e-4, rtol=1e-4)
    assert jnp.allclose(l2, l2_ref, atol=1e-4, rtol=1e-4)

    print("KERNEL_OK")
</pallas_src>

<mosaic_0001>
module attributes {stable_mosaic.version = 11 : i64} {
  func.func @policy_net_kernel(%arg0: i32, %arg1: memref<8x16xf32, #tpu.memory_space<vmem>>, %arg2: memref<16x128xf32, #tpu.memory_space<vmem>>, %arg3: memref<1x128xf32, #tpu.memory_space<vmem>>, %arg4: memref<128x128xf32, #tpu.memory_space<vmem>>, %arg5: memref<1x128xf32, #tpu.memory_space<vmem>>, %arg6: memref<128x128xf32, #tpu.memory_space<vmem>>, %arg7: memref<1x128xf32, #tpu.memory_space<vmem>>, %arg8: memref<128x128xf32, #tpu.memory_space<vmem>>, %arg9: memref<1x128xf32, #tpu.memory_space<vmem>>, %arg10: memref<8x128xf32, #tpu.memory_space<vmem>>) attributes {dimension_semantics = [#tpu.dimension_semantics<parallel>], iteration_bounds = array<i64: 1>, scalar_prefetch = 0 : i64, scratch_operands = 0 : i64, tpu.core_type = #tpu.core_type<tc>, window_params = [{transform_indices = @transform_0, window_bounds = array<i64: 8, 16>}, {pipeline_mode = #tpu.pipeline_mode<synchronous>, transform_indices = @transform_1, window_bounds = array<i64: 16, 128>}, {pipeline_mode = #tpu.pipeline_mode<synchronous>, transform_indices = @transform_2, window_bounds = array<i64: 1, 128>}, {pipeline_mode = #tpu.pipeline_mode<synchronous>, transform_indices = @transform_3, window_bounds = array<i64: 128, 128>}, {pipeline_mode = #tpu.pipeline_mode<synchronous>, transform_indices = @transform_4, window_bounds = array<i64: 1, 128>}, {pipeline_mode = #tpu.pipeline_mode<synchronous>, transform_indices = @transform_5, window_bounds = array<i64: 128, 128>}, {pipeline_mode = #tpu.pipeline_mode<synchronous>, transform_indices = @transform_6, window_bounds = array<i64: 1, 128>}, {pipeline_mode = #tpu.pipeline_mode<synchronous>, transform_indices = @transform_7, window_bounds = array<i64: 128, 128>}, {pipeline_mode = #tpu.pipeline_mode<synchronous>, transform_indices = @transform_8, window_bounds = array<i64: 1, 128>}, {transform_indices = @transform_9, window_bounds = array<i64: 8, 128>}]} {
    %c0 = arith.constant 0 : index
    %c0_0 = arith.constant 0 : index
    %0 = vector.load %arg1[%c0, %c0_0] : memref<8x16xf32, #tpu.memory_space<vmem>>, vector<8x16xf32>
    %c0_1 = arith.constant 0 : index
    %c0_2 = arith.constant 0 : index
    %1 = vector.load %arg2[%c0_1, %c0_2] : memref<16x128xf32, #tpu.memory_space<vmem>>, vector<16x128xf32>
    %cst = arith.constant dense<0.000000e+00> : vector<8x128xf32>
    %2 = tpu.matmul %0, %1, %cst {dimension_numbers = #tpu.dot_dimension_numbers<[1], [0], [0], [1], [0, 0, 1, 1], [], []>} : vector<8x16xf32>, vector<16x128xf32>, vector<8x128xf32> -> vector<8x128xf32>
    %c0_3 = arith.constant 0 : index
    %c0_4 = arith.constant 0 : index
    %3 = vector.load %arg3[%c0_3, %c0_4] : memref<1x128xf32, #tpu.memory_space<vmem>>, vector<1x128xf32>
    %4 = vector.broadcast %3 : vector<1x128xf32> to vector<8x128xf32>
    %5 = arith.addf %2, %4 : vector<8x128xf32>
    %cst_5 = arith.constant 0.000000e+00 : f32
    %6 = vector.broadcast %cst_5 : f32 to vector<8x128xf32>
    %7 = arith.maximumf %5, %6 : vector<8x128xf32>
    %c0_6 = arith.constant 0 : index
    %c0_7 = arith.constant 0 : index
    %8 = vector.load %arg4[%c0_6, %c0_7] : memref<128x128xf32, #tpu.memory_space<vmem>>, vector<128x128xf32>
    %cst_8 = arith.constant dense<0.000000e+00> : vector<8x128xf32>
    %9 = tpu.matmul %7, %8, %cst_8 {dimension_numbers = #tpu.dot_dimension_numbers<[1], [0], [0], [1], [0, 0, 1, 1], [], []>} : vector<8x128xf32>, vector<128x128xf32>, vector<8x128xf32> -> vector<8x128xf32>
    %c0_9 = arith.constant 0 : index
    %c0_10 = arith.constant 0 : index
    %10 = vector.load %arg5[%c0_9, %c0_10] : memref<1x128xf32, #tpu.memory_space<vmem>>, vector<1x128xf32>
    %11 = vector.broadcast %10 : vector<1x128xf32> to vector<8x128xf32>
    %12 = arith.addf %9, %11 : vector<8x128xf32>
    %cst_11 = arith.constant 0.000000e+00 : f32
    %13 = vector.broadcast %cst_11 : f32 to vector<8x128xf32>
    %14 = arith.maximumf %12, %13 : vector<8x128xf32>
    %c0_12 = arith.constant 0 : index
    %c0_13 = arith.constant 0 : index
    %15 = vector.load %arg6[%c0_12, %c0_13] : memref<128x128xf32, #tpu.memory_space<vmem>>, vector<128x128xf32>
    %cst_14 = arith.constant dense<0.000000e+00> : vector<8x128xf32>
    %16 = tpu.matmul %14, %15, %cst_14 {dimension_numbers = #tpu.dot_dimension_numbers<[1], [0], [0], [1], [0, 0, 1, 1], [], []>} : vector<8x128xf32>, vector<128x128xf32>, vector<8x128xf32> -> vector<8x128xf32>
    %c0_15 = arith.constant 0 : index
    %c0_16 = arith.constant 0 : index
    %17 = vector.load %arg7[%c0_15, %c0_16] : memref<1x128xf32, #tpu.memory_space<vmem>>, vector<1x128xf32>
    %18 = vector.broadcast %17 : vector<1x128xf32> to vector<8x128xf32>
    %19 = arith.addf %16, %18 : vector<8x128xf32>
    %cst_17 = arith.constant 0.000000e+00 : f32
    %20 = vector.broadcast %cst_17 : f32 to vector<8x128xf32>
    %21 = arith.maximumf %19, %20 : vector<8x128xf32>
    %c0_18 = arith.constant 0 : index
    %c0_19 = arith.constant 0 : index
    %22 = vector.load %arg8[%c0_18, %c0_19] : memref<128x128xf32, #tpu.memory_space<vmem>>, vector<128x128xf32>
    %cst_20 = arith.constant dense<0.000000e+00> : vector<8x128xf32>
    %23 = tpu.matmul %21, %22, %cst_20 {dimension_numbers = #tpu.dot_dimension_numbers<[1], [0], [0], [1], [0, 0, 1, 1], [], []>} : vector<8x128xf32>, vector<128x128xf32>, vector<8x128xf32> -> vector<8x128xf32>
    %c0_21 = arith.constant 0 : index
    %c0_22 = arith.constant 0 : index
    %24 = vector.load %arg9[%c0_21, %c0_22] : memref<1x128xf32, #tpu.memory_space<vmem>>, vector<1x128xf32>
    %25 = vector.broadcast %24 : vector<1x128xf32> to vector<8x128xf32>
    %26 = arith.addf %23, %25 : vector<8x128xf32>
    %c0_23 = arith.constant 0 : index
    %c0_24 = arith.constant 0 : index
    %27 = vector.load %arg10[%c0_23, %c0_24] : memref<8x128xf32, #tpu.memory_space<vmem>>, vector<8x128xf32>
    tpu.vector_store %arg10[%c0_23, %c0_24], %26 {strides = array<i32>} : memref<8x128xf32, #tpu.memory_space<vmem>>, vector<8x128xf32>,
    return
  }
  func.func @transform_0(%arg0: i32) -> (i32, i32) {
    %c0_i32 = arith.constant 0 : i32
    %c0_i32_0 = arith.constant 0 : i32
    return %arg0, %c0_i32 : i32, i32
  }
  func.func @transform_1(%arg0: i32) -> (i32, i32) {
    %c0_i32 = arith.constant 0 : i32
    %c0_i32_0 = arith.constant 0 : i32
    %c0_i32_1 = arith.constant 0 : i32
    return %c0_i32, %c0_i32_0 : i32, i32
  }
  func.func @transform_2(%arg0: i32) -> (i32, i32) {
    %c0_i32 = arith.constant 0 : i32
    %c0_i32_0 = arith.constant 0 : i32
    %c0_i32_1 = arith.constant 0 : i32
    return %c0_i32, %c0_i32_0 : i32, i32
  }
  func.func @transform_3(%arg0: i32) -> (i32, i32) {
    %c0_i32 = arith.constant 0 : i32
    %c0_i32_0 = arith.constant 0 : i32
    %c0_i32_1 = arith.constant 0 : i32
    return %c0_i32, %c0_i32_0 : i32, i32
  }
  func.func @transform_4(%arg0: i32) -> (i32, i32) {
    %c0_i32 = arith.constant 0 : i32
    %c0_i32_0 = arith.constant 0 : i32
    %c0_i32_1 = arith.constant 0 : i32
    return %c0_i32, %c0_i32_0 : i32, i32
  }
  func.func @transform_5(%arg0: i32) -> (i32, i32) {
    %c0_i32 = arith.constant 0 : i32
    %c0_i32_0 = arith.constant 0 : i32
    %c0_i32_1 = arith.constant 0 : i32
    return %c0_i32, %c0_i32_0 : i32, i32
  }
  func.func @transform_6(%arg0: i32) -> (i32, i32) {
    %c0_i32 = arith.constant 0 : i32
    %c0_i32_0 = arith.constant 0 : i32
    %c0_i32_1 = arith.constant 0 : i32
    return %c0_i32, %c0_i32_0 : i32, i32
  }
  func.func @transform_7(%arg0: i32) -> (i32, i32) {
    %c0_i32 = arith.constant 0 : i32
    %c0_i32_0 = arith.constant 0 : i32
    %c0_i32_1 = arith.constant 0 : i32
    return %c0_i32, %c0_i32_0 : i32, i32
  }
  func.func @transform_8(%arg0: i32) -> (i32, i32) {
    %c0_i32 = arith.constant 0 : i32
    %c0_i32_0 = arith.constant 0 : i32
    %c0_i32_1 = arith.constant 0 : i32
    return %c0_i32, %c0_i32_0 : i32, i32
  }
  func.func @transform_9(%arg0: i32) -> (i32, i32) {
    %c0_i32 = arith.constant 0 : i32
    %c0_i32_0 = arith.constant 0 : i32
    return %arg0, %c0_i32 : i32, i32
  }
}

</mosaic_0001>

<bundles_post_ra>
// kernel: tpu_custom_call.1
= control target key start
LH: loop header
LB: loop body
LE: loop exit
PB: predicated region body
PF: predicated region fallthrough
CT: control target
= control target key end

     0   :  { %14 = vsyncpa [#allocation3], 0  ;;  %s536_s0 = inlined_call_operand.hbm [shape: f32[8,16], index: 0, kind: input, shape index: {}]   ;;  %s537_s1 = inlined_call_operand.hbm [shape: f32[16,128], index: 1, kind: input, shape index: {}]   ;;  %s538_s2 = inlined_call_operand.vmem [shape: f32[1,128], index: 2, kind: input, shape index: {}]   ;;  %s539_s3 = inlined_call_operand.hbm [shape: f32[128,128], index: 3, kind: input, shape index: {}]   ;;  %s540_s4 = inlined_call_operand.vmem [shape: f32[1,128], index: 4, kind: input, shape index: {}]   ;;  %s541_s5 = inlined_call_operand.hbm [shape: f32[128,128], index: 5, kind: input, shape index: {}]   ;;  %s542_s6 = inlined_call_operand.vmem [shape: f32[1,128], index: 6, kind: input, shape index: {}]   ;;  %s543_s7 = inlined_call_operand.hbm [shape: f32[128,128], index: 7, kind: input, shape index: {}]   ;;  %s544_s8 = inlined_call_operand.vmem [shape: f32[1,128], index: 8, kind: input, shape index: {}]   ;;  %s545_s9 = inlined_call_operand.hbm [shape: f32[8,128], index: 9, kind: output, shape index: {}]  }
   0x1   :  { %15 = vsyncpa [#allocation6], 0 }
   0x2   :  { %16 = vsyncpa [#allocation9], 0  ;;  %s33_s11 = sshll.u32 %s537_s1, 4  ;;  %s34_s11 = int_to_ptr.hbm [resolvable:$true] %s33_s11 }
   0x3   :  { %17 = vsyncpa [#allocation4], 0  ;;  %s448_s12 = smov [#allocation5]   ;;  %s63_s16 = sshll.u32 %s541_s5, 4  ;;  %s64_s16 = int_to_ptr.hbm [resolvable:$true] %s63_s16 }
   0x4   :  { %s35_s13 = sshll.u32 %s448_s12, 4  ;;  %s449_s17 = smov 128   ;;  %s36_s13 = int_to_ptr.vmem [resolvable:$true] %s35_s13 }
   0x5   :  { %s450_s18 = smov 8   ;;  %s451_s19 = smov [#allocation8]  }
   0x6   :  { %41 = dma.hbm_to_vmem [thread:$0]  %s34_s11, 256, %s36_s13, [#allocation6], %s449_s17, %s449_s17, %s450_s18  }
   0x7   :  { %s65_s20 = sshll.u32 %s451_s19, 4  ;;  %s23_s23 = sshll.u32 %s536_s0, 4  ;;  %s66_s20 = int_to_ptr.vmem [resolvable:$true] %s65_s20  ;;  %s24_s23 = int_to_ptr.hbm [resolvable:$true] %s23_s23 }
   0x8   :  { %71 = dma.hbm_to_vmem [thread:$0]  %s64_s16, 2048, %s66_s20, [#allocation9], %s449_s17, %s449_s17, %s450_s18  }
   0x9   :  { %s48_s25 = sshll.u32 %s539_s3, 4  ;;  %s452_s26 = smov [#allocation2]   ;;  %s49_s25 = int_to_ptr.hbm [resolvable:$true] %s48_s25 }
   0xa   :  { %s25_s27 = sshll.u32 %s452_s26, 4  ;;  %s453_s5 = smov [#allocation7]   ;;  %s26_s27 = int_to_ptr.vmem [resolvable:$true] %s25_s27 }
   0xb   :  { %28 = dma.hbm_to_vmem [thread:$0]  %s24_s23, 128, %s26_s27, [#allocation3]  }
   0xc   :  { %s50_s28 = sshll.u32 %s453_s5, 4  ;;  %s78_s10 = sshll.u32 %s543_s7, 4  ;;  %s51_s28 = int_to_ptr.vmem [resolvable:$true] %s50_s28  ;;  %s79_s10 = int_to_ptr.hbm [resolvable:$true] %s78_s10 }
   0xd   :  { %56 = dma.hbm_to_vmem [thread:$0]  %s49_s25, 2048, %s51_s28, [#allocation6], %s449_s17, %s449_s17, %s450_s18  }
   0xe   :  { %s454_s0 = smov [#allocation10]  }
   0xf   :  { %s80_s11 = sshll.u32 %s454_s0, 4  ;;  %s81_s11 = int_to_ptr.vmem [resolvable:$true] %s80_s11 }
  0x10   :  { %86 = dma.hbm_to_vmem [thread:$0]  %s79_s10, 2048, %s81_s11, [#allocation9], %s449_s17, %s449_s17, %s450_s18  }
  0x11   :  { %440 = dma.done.wait [#allocation3], 128  }
  0x12   :  { %441 = vsyncadd [#allocation3], 4294967168 }
  0x13   :  { %442 = dma.done.wait [#allocation6], 2304  }
  0x14   :  { %443 = vsyncadd [#allocation6], 4294964992 }
  0x15   :  { %444 = dma.done.wait [#allocation9], 4096  }
  0x16   :  { %445 = vsyncadd [#allocation9], 4294963200  ;;  %v111_v0 = vld [vmem:[#allocation5 + $0x8] sm:$0xff]  ;;  %v110_v1 = vld [vmem:[#allocation5] sm:$0xff]  ;;  %vm116_vm0 = vcmask 130048   ;;  %s455_s16 = smov [#allocation11]  }
  0x17   :  { %134 = vmatpush.msra.mxu0 %v111_v0  ;;  %v109_v2 = vld [vmem:[#allocation2] sm:$0xff]  ;;  %v156_v3 = vld [vmem:[#allocation7 + $0x78] sm:$0xff]  ;;  %v155_v4 = vld [vmem:[#allocation7 + $0x70] sm:$0xff]  ;;  %s269_s17 = sshll.u32 %s455_s16, 4  ;;  %s271_s20 = sshll.u32 %s545_s9, 4  ;;  %s270_s17 = int_to_ptr.vmem [resolvable:$true] %s269_s17  ;;  %s272_s20 = int_to_ptr.hbm [resolvable:$true] %s271_s20 }
  0x18   :  { %161 = vmatpush.msra.mxu1 %v156_v3  ;;  %v154_v5 = vld [vmem:[#allocation7 + $0x68] sm:$0xff]  ;;  %v153_v6 = vld [vmem:[#allocation7 + $0x60] sm:$0xff]  ;;  %v152_v7 = vld [vmem:[#allocation7 + $0x58] sm:$0xff] }
  0x19   :  { %135 = vmatpush.msra.mxu0 %v110_v1  ;;  %v151_v8 = vld [vmem:[#allocation7 + $0x50] sm:$0xff]  ;;  %v150_v9 = vld [vmem:[#allocation7 + $0x48] sm:$0xff]  ;;  %v149_v10 = vld [vmem:[#allocation7 + $0x40] sm:$0xff] }
  0x1a   :  { %283 = vmatmul.msk.f32.vlgmr.msra.gmra.mxu0 %vm116_vm0, %v109_v2  ;;  %162 = vmatpush.msra.mxu1 %v155_v4  ;;  %v148_v11 = vld [vmem:[#allocation7 + $0x38] sm:$0xff]  ;;  %v147_v12 = vld [vmem:[#allocation7 + $0x30] sm:$0xff]  ;;  %v146_v13 = vld [vmem:[#allocation7 + $0x28] sm:$0xff] }
  0x1b   :  { %v145_v14 = vld [vmem:[#allocation7 + $0x20] sm:$0xff]  ;;  %v144_v15 = vld [vmem:[#allocation7 + $0x18] sm:$0xff]  ;;  %v143_v16 = vld [vmem:[#allocation7 + $0x10] sm:$0xff] }
  0x1c   :  { %163 = vmatpush.msra.mxu1 %v154_v5  ;;  %v142_v17 = vld [vmem:[#allocation7 + $0x8] sm:$0xff]  ;;  %v141_v18 = vld [vmem:[#allocation7] sm:$0xff]  ;;  %v197_v19 = vld [vmem:[#allocation8 + $0x78] sm:$0xff] }
  0x1d   :  { %v196_v20 = vld [vmem:[#allocation8 + $0x70] sm:$0xff]  ;;  %202 = vmatpush.msra.mxu2 %v197_v19  ;;  %v195_v21 = vld [vmem:[#allocation8 + $0x68] sm:$0xff]  ;;  %v194_v22 = vld [vmem:[#allocation8 + $0x60] sm:$0xff] }
  0x1e   :  { %164 = vmatpush.msra.mxu1 %v153_v6  ;;  %v193_v23 = vld [vmem:[#allocation8 + $0x58] sm:$0xff]  ;;  %v192_v24 = vld [vmem:[#allocation8 + $0x50] sm:$0xff]  ;;  %v191_v25 = vld [vmem:[#allocation8 + $0x48] sm:$0xff] }
  0x1f   :  { %203 = vmatpush.msra.mxu2 %v196_v20  ;;  %v190_v26 = vld [vmem:[#allocation8 + $0x40] sm:$0xff]  ;;  %v189_v27 = vld [vmem:[#allocation8 + $0x38] sm:$0xff]  ;;  %v188_v28 = vld [vmem:[#allocation8 + $0x30] sm:$0xff] }
  0x20   :  { %165 = vmatpush.msra.mxu1 %v152_v7  ;;  %v187_v29 = vld [vmem:[#allocation8 + $0x28] sm:$0xff]  ;;  %v186_v30 = vld [vmem:[#allocation8 + $0x20] sm:$0xff]  ;;  %v185_v31 = vld [vmem:[#allocation8 + $0x18] sm:$0xff] }
  0x21   :  { %204 = vmatpush.msra.mxu2 %v195_v21  ;;  %v292_v32 = vld [vmem:[%s538_s2] ss:$0 sm:$0xff]  ;;  %v184_v36 = vld [vmem:[#allocation8 + $0x10] sm:$0xff]  ;;  %v182_v38 = vld [vmem:[#allocation8] sm:$0xff] }
  0x22   :  { %166 = vmatpush.msra.mxu1 %v151_v8  ;;  %v183_v37 = vld [vmem:[#allocation8 + $0x8] sm:$0xff]  ;;  %v238_v39 = vld [vmem:[#allocation10 + $0x78] sm:$0xff]  ;;  %v237_v40 = vld [vmem:[#allocation10 + $0x70] sm:$0xff] }
  0x23   :  { %205 = vmatpush.msra.mxu2 %v194_v22  ;;  %243 = vmatpush.msra.mxu3 %v238_v39  ;;  %v236_v41 = vld [vmem:[#allocation10 + $0x68] sm:$0xff]  ;;  %v235_v42 = vld [vmem:[#allocation10 + $0x60] sm:$0xff]  ;;  %v234_v43 = vld [vmem:[#allocation10 + $0x58] sm:$0xff] }
  0x24   :  { %167 = vmatpush.msra.mxu1 %v150_v9  ;;  %v233_v44 = vld [vmem:[#allocation10 + $0x50] sm:$0xff]  ;;  %v232_v45 = vld [vmem:[#allocation10 + $0x48] sm:$0xff]  ;;  %v231_v46 = vld [vmem:[#allocation10 + $0x40] sm:$0xff] }
  0x25   :  { %206 = vmatpush.msra.mxu2 %v193_v23  ;;  %244 = vmatpush.msra.mxu3 %v237_v40  ;;  %v230_v47 = vld [vmem:[#allocation10 + $0x38] sm:$0xff]  ;;  %v229_v48 = vld [vmem:[#allocation10 + $0x30] sm:$0xff]  ;;  %v228_v49 = vld [vmem:[#allocation10 + $0x28] sm:$0xff] }
  0x26   :  { %168 = vmatpush.msra.mxu1 %v149_v10  ;;  %v227_v50 = vld [vmem:[#allocation10 + $0x20] sm:$0xff]  ;;  %v226_v51 = vld [vmem:[#allocation10 + $0x18] sm:$0xff]  ;;  %v293_v52 = vld [vmem:[%s540_s4] ss:$0 sm:$0xff] }
  0x27   :  { %207 = vmatpush.msra.mxu2 %v192_v24  ;;  %245 = vmatpush.msra.mxu3 %v236_v41  ;;  %v225_v56 = vld [vmem:[#allocation10 + $0x10] sm:$0xff]  ;;  %v224_v57 = vld [vmem:[#allocation10 + $0x8] sm:$0xff]  ;;  %v223_v58 = vld [vmem:[#allocation10] sm:$0xff] }
  0x28   :  { %169 = vmatpush.msra.mxu1 %v148_v11  ;;  %v294_v59 = vld [vmem:[%s542_s6] ss:$0 sm:$0xff] }
  0x29   :  { %208 = vmatpush.msra.mxu2 %v191_v25  ;;  %246 = vmatpush.msra.mxu3 %v235_v42  ;;  %v295_v63 = vld [vmem:[%s544_s8] ss:$0 sm:$0xff] }
  0x2a   :  { %170 = vmatpush.msra.mxu1 %v147_v12 }
  0x2b   :  { %209 = vmatpush.msra.mxu2 %v190_v26  ;;  %247 = vmatpush.msra.mxu3 %v234_v43 }
  0x2c   :  { %171 = vmatpush.msra.mxu1 %v146_v13 }
  0x2d   :  { %210 = vmatpush.msra.mxu2 %v189_v27  ;;  %248 = vmatpush.msra.mxu3 %v233_v44 }
  0x2e   :  { %172 = vmatpush.msra.mxu1 %v145_v14 }
  0x2f   :  { %211 = vmatpush.msra.mxu2 %v188_v28  ;;  %249 = vmatpush.msra.mxu3 %v232_v45 }
  0x30   :  { %173 = vmatpush.msra.mxu1 %v144_v15 }
  0x31   :  { %212 = vmatpush.msra.mxu2 %v187_v29  ;;  %250 = vmatpush.msra.mxu3 %v231_v46 }
  0x32   :  { %174 = vmatpush.msra.mxu1 %v143_v16 }
  0x33   :  { %213 = vmatpush.msra.mxu2 %v186_v30  ;;  %251 = vmatpush.msra.mxu3 %v230_v47 }
  0x34   :  { %175 = vmatpush.msra.mxu1 %v142_v17 }
  0x35   :  { %214 = vmatpush.msra.mxu2 %v185_v31  ;;  %252 = vmatpush.msra.mxu3 %v229_v48 }
  0x36   :  { %176 = vmatpush.msra.mxu1 %v141_v18 }
  0x37   :  { %215 = vmatpush.msra.mxu2 %v184_v36  ;;  %253 = vmatpush.msra.mxu3 %v228_v49 }
  0x39   :  { %216 = vmatpush.msra.mxu2 %v183_v37  ;;  %254 = vmatpush.msra.mxu3 %v227_v50 }
  0x3b   :  { %217 = vmatpush.msra.mxu2 %v182_v38  ;;  %255 = vmatpush.msra.mxu3 %v226_v51 }
  0x3d   :  { %256 = vmatpush.msra.mxu3 %v225_v56 }
  0x3f   :  { %257 = vmatpush.msra.mxu3 %v224_v57 }
  0x41   :  { %258 = vmatpush.msra.mxu3 %v223_v58 }
  0x97   :  { %v137_v33 = vpop.f32.mrf.mxu0 }
  0x98   :  { %v138_v34 = vadd.f32 %v292_v32, %v137_v33 }
  0x9a   :  { %v140_v35 = vmax.f32 %v138_v34, 0.0 }
  0x9c   :  { %177 = vmatmul.f32.vlgmr.msra.gmra.mxu1 %v140_v35 }
 0x119   :  { %v178_v53 = vpop.f32.mrf.mxu1 }
 0x11a   :  { %v179_v54 = vadd.f32 %v293_v52, %v178_v53 }
 0x11c   :  { %v181_v55 = vmax.f32 %v179_v54, 0.0 }
 0x11e   :  { %218 = vmatmul.f32.vlgmr.msra.gmra.mxu2 %v181_v55 }
 0x1a1   :  { %v219_v60 = vpop.f32.mrf.mxu2 }
 0x1a2   :  { %v220_v61 = vadd.f32 %v294_v59, %v219_v60 }
 0x1a4   :  { %v222_v62 = vmax.f32 %v220_v61, 0.0 }
 0x1a6   :  { %259 = vmatmul.f32.vlgmr.msra.gmra.mxu3 %v222_v62 }
 0x229   :  { %v260_v0 = vpop.f32.mrf.mxu3 }
 0x22a   :  { %v261_v1 = vadd.f32 %v295_v63, %v260_v0 }
 0x22c   :  { %263 = vst [vmem:[#allocation11] sm:$0xff] %v261_v1 }
 0x22d   :  { %274 = dma.vmem_to_hbm [thread:$0]  %s270_s17, 128, %s272_s20, [#allocation4]  }
 0x22e   :  { %446 = dma.done.wait [#allocation4], 128  }
 0x22f   :  { %447 = vsyncadd [#allocation4], 4294967168 }
 0x230   :  { %279 = vsyncpa [#allocation3], 1 }
 0x231   :  { %280 = vsyncpa [#allocation6], 1 }
 0x232   :  { %281 = vsyncpa [#allocation9], 1 }
 0x233   :  { %282 = vsyncpa [#allocation4], 1 }

</bundles_post_ra>
